<compile_context>
chip_gen: v6e
topology: v6e:2x2x1
jax: 0.10.0
libtpu: 0.0.40
codegen_flags: <defaults>
</compile_context>

<pallas_src>
import jax
import jax.numpy as jnp
from jax.experimental import pallas as pl
from jax.experimental.pallas import tpu as pltpu


_LANE = 128
_H1, _H2 = 512, 256          # hidden widths fixed by the PyTorch module
_DEFAULT_K_TILE = 512        # K tile for the layer-1 K-grid path


def _round_up(x, m):
    return ((x + m - 1) // m) * m


def _vmem_budget_bytes():
    """~85% of this generation's per-core VMEM (leaves compiler headroom)."""
    try:
        cap = int(pltpu.get_tpu_info().vmem_capacity_bytes)
    except Exception:
        cap = 64 * 1024 * 1024   # conservative fallback: v7x per-core VMEM
    return int(0.85 * cap)


# ---------------------------------------------------------------------------
# Kernels
# ---------------------------------------------------------------------------
def voxel_fcn_kernel(x_ref, w1_ref, b1_ref, w2_ref, b2_ref, w3_ref, b3_ref,
                     o_ref):
    """Fused 3-layer MLP on one batch tile (weights fully resident).

    Matmuls run on the MXU with bf16 inputs / f32 accumulation; the f32->bf16
    cast of x and the bias+ReLU math stay in f32 on the VPU.
    """
    x = x_ref[...].astype(w1_ref.dtype)                       # f32 -> bf16 on VPU
    h1 = jnp.dot(x, w1_ref[...], preferred_element_type=jnp.float32)
    h1 = jnp.maximum(h1 + b1_ref[...], 0.0)
    h2 = jnp.dot(h1.astype(w2_ref.dtype), w2_ref[...],
                 preferred_element_type=jnp.float32)
    h2 = jnp.maximum(h2 + b2_ref[...], 0.0)
    h3 = jnp.dot(h2.astype(w3_ref.dtype), w3_ref[...],
                 preferred_element_type=jnp.float32)
    o_ref[...] = (h3 + b3_ref[...]).astype(o_ref.dtype)


def voxel_fcn_ktiled_kernel(x_ref, w1_ref, b1_ref, w2_ref, b2_ref, w3_ref,
                            b3_ref, o_ref, acc_ref):
    """Same MLP, but layer 1 is K-tiled (grid axis 1) with an f32 accumulator.

    Used when a resident bf16 w1 would not fit the VMEM budget (large voxel
    D_in on v7x's 64 MiB VMEM).  Layers 2/3 + the store run on the last K step.
    """
    k = pl.program_id(1)

    @pl.when(k == 0)
    def _():
        acc_ref[...] = jnp.zeros_like(acc_ref)

    x = x_ref[...].astype(w1_ref.dtype)
    acc_ref[...] += jnp.dot(x, w1_ref[...], preferred_element_type=jnp.float32)

    @pl.when(k == pl.num_programs(1) - 1)
    def _():
        h1 = jnp.maximum(acc_ref[...] + b1_ref[...], 0.0)
        h2 = jnp.dot(h1.astype(w2_ref.dtype), w2_ref[...],
                     preferred_element_type=jnp.float32)
        h2 = jnp.maximum(h2 + b2_ref[...], 0.0)
        h3 = jnp.dot(h2.astype(w3_ref.dtype), w3_ref[...],
                     preferred_element_type=jnp.float32)
        o_ref[...] = (h3 + b3_ref[...]).astype(o_ref.dtype)


# ---------------------------------------------------------------------------
# One-time parameter preparation (cast / pad weights exactly once)
# ---------------------------------------------------------------------------
def prepare_params(params, *, compute_dtype=jnp.bfloat16, k_tile=None):
    """Cast weights to the MXU dtype and lane-pad the output dim, once.

    Returns (prepared_arrays, meta).  If `k_tile` is None it is auto-enabled
    when a resident bf16 w1 would eat more than ~1/3 of the VMEM budget.
    """
    w1, w2, w3 = params["w1"], params["w2"], params["w3"]
    b1, b2, b3 = params["b1"], params["b2"], params["b3"]
    d_in, d_out = w1.shape[0], w3.shape[1]
    assert w1.shape[1] == _H1 and w2.shape == (_H1, _H2) and w3.shape[0] == _H2
    d_out_p = _round_up(d_out, _LANE)
    itemsize = jnp.dtype(compute_dtype).itemsize

    if k_tile is None:
        if d_in * _H1 * itemsize > _vmem_budget_bytes() // 3:
            k_tile = _DEFAULT_K_TILE
    if k_tile is not None:
        k_tile = max(_LANE, _round_up(int(k_tile), _LANE))
        d_in_p = _round_up(d_in, k_tile)
    else:
        d_in_p = d_in   # no K padding needed on the resident-weight path

    prepared = {
        "w1": jnp.pad(w1.astype(compute_dtype), ((0, d_in_p - d_in), (0, 0))),
        "b1": b1.reshape(1, _H1).astype(jnp.float32),
        "w2": w2.astype(compute_dtype),
        "b2": b2.reshape(1, _H2).astype(jnp.float32),
        "w3": jnp.pad(w3.astype(compute_dtype), ((0, 0), (0, d_out_p - d_out))),
        "b3": jnp.pad(b3.reshape(1, d_out).astype(jnp.float32),
                      ((0, 0), (0, d_out_p - d_out))),
    }
    meta = dict(d_in=d_in, d_in_p=d_in_p, d_out=d_out, d_out_p=d_out_p,
                k_tile=k_tile, compute_dtype=compute_dtype)
    return prepared, meta


# ---------------------------------------------------------------------------
# Tile sizing from the VMEM budget
# ---------------------------------------------------------------------------
def _pick_tile_b(B, *, x_cols, d_out_p, resident_bytes, budget):
    # Per-row VMEM cost of one grid step: double-buffered x / out tiles,
    # f32 activation temps, bf16 MXU staging copies.
    per_row = (2 * x_cols * 4                # x tile (f32), double-buffered
               + 2 * d_out_p * 4             # out tile (f32), double-buffered
               + (_H1 + _H2 + d_out_p) * 4   # f32 activations / accumulator
               + (x_cols + _H1 + _H2) * 2)   # bf16 copies feeding the MXU
    avail = budget - resident_bytes
    avail = max(avail, per_row * 16, budget // 8)
    cap = avail // per_row
    tile = int(min(512, cap, _round_up(B, 16)))
    if tile >= _LANE:
        tile = (tile // _LANE) * _LANE       # multiple of 128: full MXU M fill
    else:
        tile = _round_up(max(tile, 16), 16)  # minimum 16: clean bf16 packing
    return tile


# ---------------------------------------------------------------------------
# Wrapper
# ---------------------------------------------------------------------------
def voxel_fcn(x, prepared, meta, *, tile_b=None):
    """x: (B, D_in) float32.  prepared/meta: from prepare_params()."""
    B, d_in = x.shape
    assert d_in == meta["d_in"], (d_in, meta["d_in"])
    d_in_p, d_out, d_out_p = meta["d_in_p"], meta["d_out"], meta["d_out_p"]
    k_tile = meta["k_tile"]
    itemsize = jnp.dtype(meta["compute_dtype"]).itemsize
    budget = _vmem_budget_bytes()

    w1, b1 = prepared["w1"], prepared["b1"]
    w2, b2 = prepared["w2"], prepared["b2"]
    w3, b3 = prepared["w3"], prepared["b3"]
    bias_bytes = (b1.size + b2.size + b3.size) * 4

    if k_tile is None:
        # Weights fully resident; budget assumes default double-buffering.
        resident = 2 * (w1.size + w2.size + w3.size) * itemsize + 2 * bias_bytes
        x_cols = d_in
    else:
        # Only a (k_tile, 512) slab of w1 is live (double-buffered) per step.
        resident = (2 * (k_tile * _H1 + w2.size + w3.size) * itemsize
                    + 2 * bias_bytes)
        x_cols = k_tile

    if tile_b is None:
        tile_b = _pick_tile_b(B, x_cols=x_cols, d_out_p=d_out_p,
                              resident_bytes=resident, budget=budget)
    tile_b = max(8, _round_up(int(tile_b), 8))
    B_p = _round_up(B, tile_b)

    # Pad only what is strictly needed (batch; K only on the K-tiled path).
    pad_rows, pad_cols = B_p - B, d_in_p - d_in
    x_in = jnp.pad(x, ((0, pad_rows), (0, pad_cols))) if (pad_rows or pad_cols) else x

    flops = 2 * B_p * (d_in_p * _H1 + _H1 * _H2 + _H2 * d_out_p)
    bytes_accessed = (B_p * d_in_p * 4
                      + (w1.size + w2.size + w3.size) * itemsize
                      + bias_bytes
                      + B_p * d_out_p * 4)
    cost = pl.CostEstimate(flops=flops, transcendentals=0,
                           bytes_accessed=bytes_accessed)

    if k_tile is None:
        grid = (B_p // tile_b,)
        in_specs = [
            pl.BlockSpec((tile_b, d_in), lambda i: (i, 0)),
            pl.BlockSpec((d_in, _H1), lambda i: (0, 0)),
            pl.BlockSpec((1, _H1), lambda i: (0, 0)),
            pl.BlockSpec((_H1, _H2), lambda i: (0, 0)),
            pl.BlockSpec((1, _H2), lambda i: (0, 0)),
            pl.BlockSpec((_H2, d_out_p), lambda i: (0, 0)),
            pl.BlockSpec((1, d_out_p), lambda i: (0, 0)),
        ]
        out_spec = pl.BlockSpec((tile_b, d_out_p), lambda i: (i, 0))
        scratch = []
        kernel = voxel_fcn_kernel
        semantics = ("parallel",)
    else:
        grid = (B_p // tile_b, d_in_p // k_tile)
        in_specs = [
            pl.BlockSpec((tile_b, k_tile), lambda i, k: (i, k)),
            pl.BlockSpec((k_tile, _H1), lambda i, k: (k, 0)),
            pl.BlockSpec((1, _H1), lambda i, k: (0, 0)),
            pl.BlockSpec((_H1, _H2), lambda i, k: (0, 0)),
            pl.BlockSpec((1, _H2), lambda i, k: (0, 0)),
            pl.BlockSpec((_H2, d_out_p), lambda i, k: (0, 0)),
            pl.BlockSpec((1, d_out_p), lambda i, k: (0, 0)),
        ]
        out_spec = pl.BlockSpec((tile_b, d_out_p), lambda i, k: (i, 0))
        scratch = [pltpu.VMEM((tile_b, _H1), jnp.float32)]
        kernel = voxel_fcn_ktiled_kernel
        semantics = ("parallel", "arbitrary")

    out_p = pl.pallas_call(
        kernel,
        out_shape=jax.ShapeDtypeStruct((B_p, d_out_p), jnp.float32),
        grid_spec=pltpu.PrefetchScalarGridSpec(
            num_scalar_prefetch=0,
            grid=grid,
            in_specs=in_specs,
            out_specs=out_spec,
            scratch_shapes=scratch,
        ),
        compiler_params=pltpu.CompilerParams(
            dimension_semantics=semantics,
            vmem_limit_bytes=budget,
        ),
        cost_estimate=cost,
    )(x_in, w1, b1, w2, b2, w3, b3)

    if B_p != B or d_out_p != d_out:   # skip the slice copy when it's a no-op
        out_p = out_p[:B, :d_out]
    return out_p


# ---------------------------------------------------------------------------
# Init + reference
# ---------------------------------------------------------------------------
def init_params(key, input_size, output_size=128):
    """Mimics PyTorch nn.Linear default init (U(-1/sqrt(fan_in), +1/sqrt(fan_in)))."""
    dims = [(input_size, _H1), (_H1, _H2), (_H2, output_size)]
    params = {}
    for idx, (d_in, d_out) in enumerate(dims, start=1):
        key, kw, kb = jax.random.split(key, 3)
        bound = 1.0 / jnp.sqrt(jnp.float32(d_in))
        params[f"w{idx}"] = jax.random.uniform(
            kw, (d_in, d_out), jnp.float32, -bound, bound)
        params[f"b{idx}"] = jax.random.uniform(
            kb, (1, d_out), jnp.float32, -bound, bound)
    return params


def reference(x, params, dtype=jnp.float32):
    """Pure-JAX reference; `dtype` mirrors the kernel's MXU input precision."""
    w1 = params["w1"].astype(dtype)
    w2 = params["w2"].astype(dtype)
    w3 = params["w3"].astype(dtype)
    h = jnp.maximum(
        jnp.dot(x.astype(dtype), w1, preferred_element_type=jnp.float32)
        + params["b1"], 0.0)
    h = jnp.maximum(
        jnp.dot(h.astype(dtype), w2, preferred_element_type=jnp.float32)
        + params["b2"], 0.0)
    return (jnp.dot(h.astype(dtype), w3, preferred_element_type=jnp.float32)
            + params["b3"])


if __name__ == "__main__":
    key = jax.random.PRNGKey(0)
    k_x1, k_p1, k_x2, k_p2 = jax.random.split(key, 4)

    # --- Path 1: resident-weight path (default). Batch deliberately not a
    # multiple of 8 to exercise the batch-padding logic; D_in not a multiple
    # of 128 to exercise the unpadded full-K BlockSpec.
    batch, input_size, output_size = 6, 32, 128
    x = jax.random.normal(k_x1, (batch, input_size), jnp.float32)
    params = init_params(k_p1, input_size, output_size)
    prepared, meta = prepare_params(params)
    out = jax.block_until_ready(voxel_fcn(x, prepared, meta))
    assert out.shape == (batch, output_size)
    ref = reference(x, params, dtype=jnp.bfloat16)
    err = float(jnp.max(jnp.abs(out - ref)))
    assert jnp.allclose(out, ref, atol=1e-2, rtol=1e-2), err

    # --- Path 2: K-tiled layer-1 path, forced small so it is compiled/tested
    # here too (production auto-enables it only for very large voxel D_in).
    batch2, input_size2 = 20, 320
    x2 = jax.random.normal(k_x2, (batch2, input_size2), jnp.float32)
    params2 = init_params(k_p2, input_size2, output_size)
    prepared2, meta2 = prepare_params(params2, k_tile=128)   # 320 -> 384: 3 K steps
    out2 = jax.block_until_ready(voxel_fcn(x2, prepared2, meta2))
    assert out2.shape == (batch2, output_size)
    ref2 = reference(x2, params2, dtype=jnp.bfloat16)
    err2 = float(jnp.max(jnp.abs(out2 - ref2)))
    assert jnp.allclose(out2, ref2, atol=1e-2, rtol=1e-2), err2

    print("KERNEL_OK")
</pallas_src>

<mosaic_0001>
module attributes {stable_mosaic.version = 11 : i64} {
  func.func @voxel_fcn_kernel(%arg0: i32, %arg1: memref<16x32xf32, #tpu.memory_space<vmem>>, %arg2: memref<32x512xbf16, #tpu.memory_space<vmem>>, %arg3: memref<1x512xf32, #tpu.memory_space<vmem>>, %arg4: memref<512x256xbf16, #tpu.memory_space<vmem>>, %arg5: memref<1x256xf32, #tpu.memory_space<vmem>>, %arg6: memref<256x128xbf16, #tpu.memory_space<vmem>>, %arg7: memref<1x128xf32, #tpu.memory_space<vmem>>, %arg8: memref<16x128xf32, #tpu.memory_space<vmem>>) attributes {dimension_semantics = [#tpu.dimension_semantics<parallel>], iteration_bounds = array<i64: 1>, scalar_prefetch = 0 : i64, scratch_operands = 0 : i64, tpu.core_type = #tpu.core_type<tc>, window_params = [{transform_indices = @transform_0, window_bounds = array<i64: 16, 32>}, {pipeline_mode = #tpu.pipeline_mode<synchronous>, transform_indices = @transform_1, window_bounds = array<i64: 32, 512>}, {pipeline_mode = #tpu.pipeline_mode<synchronous>, transform_indices = @transform_2, window_bounds = array<i64: 1, 512>}, {pipeline_mode = #tpu.pipeline_mode<synchronous>, transform_indices = @transform_3, window_bounds = array<i64: 512, 256>}, {pipeline_mode = #tpu.pipeline_mode<synchronous>, transform_indices = @transform_4, window_bounds = array<i64: 1, 256>}, {pipeline_mode = #tpu.pipeline_mode<synchronous>, transform_indices = @transform_5, window_bounds = array<i64: 256, 128>}, {pipeline_mode = #tpu.pipeline_mode<synchronous>, transform_indices = @transform_6, window_bounds = array<i64: 1, 128>}, {transform_indices = @transform_7, window_bounds = array<i64: 16, 128>}]} {
    %c0 = arith.constant 0 : index
    %c0_0 = arith.constant 0 : index
    %0 = vector.load %arg1[%c0, %c0_0] : memref<16x32xf32, #tpu.memory_space<vmem>>, vector<16x32xf32>
    %1 = arith.truncf %0 : vector<16x32xf32> to vector<16x32xbf16>
    %c0_1 = arith.constant 0 : index
    %c0_2 = arith.constant 0 : index
    %2 = vector.load %arg2[%c0_1, %c0_2] : memref<32x512xbf16, #tpu.memory_space<vmem>>, vector<32x512xbf16>
    %cst = arith.constant dense<0.000000e+00> : vector<16x512xf32>
    %3 = tpu.matmul %1, %2, %cst {dimension_numbers = #tpu.dot_dimension_numbers<[1], [0], [0], [1], [0, 0, 1, 1], [], []>} : vector<16x32xbf16>, vector<32x512xbf16>, vector<16x512xf32> -> vector<16x512xf32>
    %c0_3 = arith.constant 0 : index
    %c0_4 = arith.constant 0 : index
    %4 = vector.load %arg3[%c0_3, %c0_4] : memref<1x512xf32, #tpu.memory_space<vmem>>, vector<1x512xf32>
    %5 = vector.broadcast %4 : vector<1x512xf32> to vector<16x512xf32>
    %6 = arith.addf %3, %5 : vector<16x512xf32>
    %cst_5 = arith.constant 0.000000e+00 : f32
    %7 = vector.broadcast %cst_5 : f32 to vector<16x512xf32>
    %8 = arith.maximumf %6, %7 : vector<16x512xf32>
    %9 = arith.truncf %8 : vector<16x512xf32> to vector<16x512xbf16>
    %c0_6 = arith.constant 0 : index
    %c0_7 = arith.constant 0 : index
    %10 = vector.load %arg4[%c0_6, %c0_7] : memref<512x256xbf16, #tpu.memory_space<vmem>>, vector<512x256xbf16>
    %cst_8 = arith.constant dense<0.000000e+00> : vector<16x256xf32>
    %11 = tpu.matmul %9, %10, %cst_8 {dimension_numbers = #tpu.dot_dimension_numbers<[1], [0], [0], [1], [0, 0, 1, 1], [], []>} : vector<16x512xbf16>, vector<512x256xbf16>, vector<16x256xf32> -> vector<16x256xf32>
    %c0_9 = arith.constant 0 : index
    %c0_10 = arith.constant 0 : index
    %12 = vector.load %arg5[%c0_9, %c0_10] : memref<1x256xf32, #tpu.memory_space<vmem>>, vector<1x256xf32>
    %13 = vector.broadcast %12 : vector<1x256xf32> to vector<16x256xf32>
    %14 = arith.addf %11, %13 : vector<16x256xf32>
    %cst_11 = arith.constant 0.000000e+00 : f32
    %15 = vector.broadcast %cst_11 : f32 to vector<16x256xf32>
    %16 = arith.maximumf %14, %15 : vector<16x256xf32>
    %17 = arith.truncf %16 : vector<16x256xf32> to vector<16x256xbf16>
    %c0_12 = arith.constant 0 : index
    %c0_13 = arith.constant 0 : index
    %18 = vector.load %arg6[%c0_12, %c0_13] : memref<256x128xbf16, #tpu.memory_space<vmem>>, vector<256x128xbf16>
    %cst_14 = arith.constant dense<0.000000e+00> : vector<16x128xf32>
    %19 = tpu.matmul %17, %18, %cst_14 {dimension_numbers = #tpu.dot_dimension_numbers<[1], [0], [0], [1], [0, 0, 1, 1], [], []>} : vector<16x256xbf16>, vector<256x128xbf16>, vector<16x128xf32> -> vector<16x128xf32>
    %c0_15 = arith.constant 0 : index
    %c0_16 = arith.constant 0 : index
    %20 = vector.load %arg7[%c0_15, %c0_16] : memref<1x128xf32, #tpu.memory_space<vmem>>, vector<1x128xf32>
    %21 = vector.broadcast %20 : vector<1x128xf32> to vector<16x128xf32>
    %22 = arith.addf %19, %21 : vector<16x128xf32>
    %c0_17 = arith.constant 0 : index
    %c0_18 = arith.constant 0 : index
    %23 = vector.load %arg8[%c0_17, %c0_18] : memref<16x128xf32, #tpu.memory_space<vmem>>, vector<16x128xf32>
    tpu.vector_store %arg8[%c0_17, %c0_18], %22 {strides = array<i32>} : memref<16x128xf32, #tpu.memory_space<vmem>>, vector<16x128xf32>,
    return
  }
  func.func @transform_0(%arg0: i32) -> (i32, i32) {
    %c0_i32 = arith.constant 0 : i32
    %c0_i32_0 = arith.constant 0 : i32
    return %arg0, %c0_i32 : i32, i32
  }
  func.func @transform_1(%arg0: i32) -> (i32, i32) {
    %c0_i32 = arith.constant 0 : i32
    %c0_i32_0 = arith.constant 0 : i32
    %c0_i32_1 = arith.constant 0 : i32
    return %c0_i32, %c0_i32_0 : i32, i32
  }
  func.func @transform_2(%arg0: i32) -> (i32, i32) {
    %c0_i32 = arith.constant 0 : i32
    %c0_i32_0 = arith.constant 0 : i32
    %c0_i32_1 = arith.constant 0 : i32
    return %c0_i32, %c0_i32_0 : i32, i32
  }
  func.func @transform_3(%arg0: i32) -> (i32, i32) {
    %c0_i32 = arith.constant 0 : i32
    %c0_i32_0 = arith.constant 0 : i32
    %c0_i32_1 = arith.constant 0 : i32
    return %c0_i32, %c0_i32_0 : i32, i32
  }
  func.func @transform_4(%arg0: i32) -> (i32, i32) {
    %c0_i32 = arith.constant 0 : i32
    %c0_i32_0 = arith.constant 0 : i32
    %c0_i32_1 = arith.constant 0 : i32
    return %c0_i32, %c0_i32_0 : i32, i32
  }
  func.func @transform_5(%arg0: i32) -> (i32, i32) {
    %c0_i32 = arith.constant 0 : i32
    %c0_i32_0 = arith.constant 0 : i32
    %c0_i32_1 = arith.constant 0 : i32
    return %c0_i32, %c0_i32_0 : i32, i32
  }
  func.func @transform_6(%arg0: i32) -> (i32, i32) {
    %c0_i32 = arith.constant 0 : i32
    %c0_i32_0 = arith.constant 0 : i32
    %c0_i32_1 = arith.constant 0 : i32
    return %c0_i32, %c0_i32_0 : i32, i32
  }
  func.func @transform_7(%arg0: i32) -> (i32, i32) {
    %c0_i32 = arith.constant 0 : i32
    %c0_i32_0 = arith.constant 0 : i32
    return %arg0, %c0_i32 : i32, i32
  }
}

</mosaic_0001>

<bundles_post_ra>
// kernel: tpu_custom_call.1
= control target key start
LH: loop header
LB: loop body
LE: loop exit
PB: predicated region body
PF: predicated region fallthrough
CT: control target
= control target key end

     0   :  { %12 = vsyncpa [#allocation3], 0  ;;  %s1434_s0 = inlined_call_operand.hbm [shape: f32[16,32], index: 0, kind: input, shape index: {}]   ;;  %s1435_s1 = inlined_call_operand.hbm [shape: bf16[32,512], index: 1, kind: input, shape index: {}]   ;;  %s1436_s2 = inlined_call_operand.hbm [shape: f32[1,512], index: 2, kind: input, shape index: {}]   ;;  %s1437_s3 = inlined_call_operand.hbm [shape: bf16[512,256], index: 3, kind: input, shape index: {}]   ;;  %s1438_s4 = inlined_call_operand.vmem [shape: f32[1,256], index: 4, kind: input, shape index: {}]   ;;  %s1439_s5 = inlined_call_operand.hbm [shape: bf16[256,128], index: 5, kind: input, shape index: {}]   ;;  %s1440_s6 = inlined_call_operand.vmem [shape: f32[1,128], index: 6, kind: input, shape index: {}]   ;;  %s1441_s7 = inlined_call_operand.hbm [shape: f32[16,128], index: 7, kind: output, shape index: {}]  }
   0x1   :  { %13 = vsyncpa [#allocation6], 0 }
   0x2   :  { %14 = vsyncpa [#allocation9], 0 }
   0x3   :  { %15 = vsyncpa [#allocation4], 0  ;;  %s1332_s24 = smov [#allocation5]  }
   0x4   :  { %s33_s25 = sshll.u32 %s1332_s24, 4  ;;  %s34_s25 = int_to_ptr.vmem [resolvable:$true] %s33_s25 }
   0x5   :  { %s1212_s26 = scalar_lea.vmem %s34_s25, 1024  ;;  %p1217_p1 = scmp.lt.s32.totalorder %s34_s25, %s34_s25 }
   0x6   :  { %p1213_p0 = scmp.ne.s32.totalorder %s34_s25, %s1212_s26  ;;  %p1218_p2 = scmp.lt.s32.totalorder %s1212_s26, %s1212_s26 }
   0x8   :  { %p1219_p3 = por %p1218_p2, %p1217_p1 }
   0xa   :  { %p1220_p4 = pnand %p1219_p3, %p1213_p0 }
   0xc   :  { %1223 = shalt.err (!%p1220_p4)
}
   0xd   :  { %s1333_s27 = smov 256   ;;  %s1334_s28 = smov 16  }
   0xe   :  { %39 = dma.hbm_to_vmem [thread:$0]  %s1435_s1, 1024, %s34_s25, [#allocation6], %s1333_s27, %s1333_s27, %s1334_s28  }
   0xf   :  { %s1335_s8 = smov [#allocation8]   ;;  %s1336_s10 = smov [#allocation2]  }
  0x10   :  { %s55_s9 = sshll.u32 %s1335_s8, 4  ;;  %s21_s11 = sshll.u32 %s1336_s10, 4  ;;  %s56_s9 = int_to_ptr.vmem [resolvable:$true] %s55_s9  ;;  %s22_s11 = int_to_ptr.vmem [resolvable:$true] %s21_s11 }
  0x11   :  { %s1232_s12 = scalar_lea.vmem %s56_s9, 8192  ;;  %p1237_p6 = scmp.lt.s32.totalorder %s56_s9, %s56_s9 }
  0x12   :  { %p1233_p5 = scmp.ne.s32.totalorder %s56_s9, %s1232_s12  ;;  %p1238_p7 = scmp.lt.s32.totalorder %s1232_s12, %s1232_s12 }
  0x14   :  { %p1239_p8 = por %p1238_p7, %p1237_p6 }
  0x16   :  { %p1240_p9 = pnand %p1239_p8, %p1233_p5 }
  0x18   :  { %1243 = shalt.err (!%p1240_p9)
}
  0x19   :  { %s1337_s13 = smov 128   ;;  %s1338_s14 = smov 8  }
  0x1a   :  { %61 = dma.hbm_to_vmem [thread:$0]  %s1437_s3, 8192, %s56_s9, [#allocation9], %s1337_s13, %s1337_s13, %s1338_s14  }
  0x1b   :  { %s1252_s1 = scalar_lea.vmem %s22_s11, 256  ;;  %p1257_p11 = scmp.lt.s32.totalorder %s22_s11, %s22_s11 }
  0x1c   :  { %p1253_p10 = scmp.ne.s32.totalorder %s22_s11, %s1252_s1  ;;  %p1258_p12 = scmp.lt.s32.totalorder %s1252_s1, %s1252_s1 }
  0x1e   :  { %p1259_p13 = por %p1258_p12, %p1257_p11 }
  0x20   :  { %p1260_p0 = pnand %p1259_p13, %p1253_p10 }
  0x22   :  { %1263 = shalt.err (!%p1260_p0)
}
  0x23   :  { %27 = dma.hbm_to_vmem [thread:$0]  %s1434_s0, 256, %s22_s11, [#allocation3], %s1337_s13, %s1337_s13, %s1338_s14  }
  0x24   :  { %s1339_s19 = smov [#allocation7]   ;;  %s1340_s21 = smov [#allocation10]  }
  0x25   :  { %s46_s20 = sshll.u32 %s1339_s19, 4  ;;  %s69_s3 = sshll.u32 %s1340_s21, 4  ;;  %s47_s20 = int_to_ptr.vmem [resolvable:$true] %s46_s20  ;;  %s70_s3 = int_to_ptr.vmem [resolvable:$true] %s69_s3 }
  0x26   :  { %s1272_s22 = scalar_lea.vmem %s47_s20, 64  ;;  %p1277_p2 = scmp.lt.s32.totalorder %s47_s20, %s47_s20 }
  0x27   :  { %p1273_p1 = scmp.ne.s32.totalorder %s47_s20, %s1272_s22  ;;  %p1278_p3 = scmp.lt.s32.totalorder %s1272_s22, %s1272_s22 }
  0x29   :  { %p1279_p4 = por %p1278_p3, %p1277_p2 }
  0x2b   :  { %p1280_p5 = pnand %p1279_p4, %p1273_p1 }
  0x2d   :  { %1283 = shalt.err (!%p1280_p5)
}
  0x2e   :  { %49 = dma.hbm_to_vmem [thread:$0]  %s1436_s2, 64, %s47_s20, [#allocation6]  }
  0x2f   :  { %s1292_s25 = scalar_lea.vmem %s70_s3, 2048  ;;  %p1297_p7 = scmp.lt.s32.totalorder %s70_s3, %s70_s3 }
  0x30   :  { %p1293_p6 = scmp.ne.s32.totalorder %s70_s3, %s1292_s25  ;;  %p1298_p8 = scmp.lt.s32.totalorder %s1292_s25, %s1292_s25 }
  0x32   :  { %p1299_p9 = por %p1298_p8, %p1297_p7 }
  0x34   :  { %p1300_p10 = pnand %p1299_p9, %p1293_p6 }
  0x36   :  { %1303 = shalt.err (!%p1300_p10)
}
  0x37   :  { %s1341_s0 = smov 64   ;;  %s1342_s26 = smov 4  }
  0x38   :  { %75 = dma.hbm_to_vmem [thread:$0]  %s1439_s5, 2048, %s70_s3, [#allocation9], %s1341_s0, %s1341_s0, %s1342_s26  }
  0x39   :  { %1324 = dma.done.wait [#allocation3], 256  }
  0x3a   :  { %1325 = vsyncadd [#allocation3], 4294967040 }
  0x3b   :  { %1326 = dma.done.wait [#allocation6], 1088  }
  0x3c   :  { %1327 = vsyncadd [#allocation6], 4294966208 }
  0x3d   :  { %1328 = dma.done.wait [#allocation9], 10240  }
  0x3e   :  { %1329 = vsyncadd [#allocation9], 4294957056  ;;  %v1343_v0 = vmov 0   ;;  %v1080_v1 = vld [vmem:[#allocation5 + $0x24] ss:$16 sps:$4 sm:$0xff]   ;;  %v95_v6 = vld [vmem:[#allocation2 + $0x8] sm:$0xff] }
  0x3f   :  { %203 = vmatprep.mubr.bf16.mxu1 %v1343_v0  ;;  %v1082_v2 = vld [vmem:[#allocation5 + $0x20] ss:$16 sps:$4 sm:$0xff]   ;;  %183 = vmatprep.subr.bf16.mxu1 %v1080_v1  ;;  %v1083_v3 = vld [vmem:[#allocation5 + $0x4] ss:$16 sps:$4 sm:$0xff]   ;;  %v1088_v7 = vld [vmem:[#allocation5 + $0x2c] ss:$16 sps:$4 sm:$0xff]  }
  0x40   :  { %v1085_v4 = vld [vmem:[#allocation5] ss:$16 sps:$4 sm:$0xff]   ;;  %184 = vmatpush1.bf16.msra.mxu1 %v1082_v2  ;;  %v1086_v8 = vld [vmem:[#allocation5 + $0x28] ss:$16 sps:$4 sm:$0xff]   ;;  %vm167_vm0 = vcmask 261120   ;;  %s1344_s30 = smov [#allocation11]  }
  0x41   :  { %v94_v5 = vld [vmem:[#allocation2] sm:$0xff]  ;;  %185 = vmatprep.subr.bf16.mxu1 %v1083_v3  ;;  %v1092_v10 = vld [vmem:[#allocation8 + $0x74] ss:$8 sps:$4 sm:$0xff]   ;;  %v1091_v12 = vld [vmem:[#allocation5 + $0xc] ss:$16 sps:$4 sm:$0xff]   ;;  %s940_s8 = sshll.u32 %s1344_s30, 4  ;;  %s941_s8 = int_to_ptr.vmem [resolvable:$true] %s940_s8 }
  0x42   :  { %v96_v9 = vpack.c.bf16 %v95_v6, %v94_v5  ;;  %v1094_v11 = vld [vmem:[#allocation8 + $0x70] ss:$8 sps:$4 sm:$0xff]   ;;  %665 = vmatprep.subr.bf16.mxu0 %v1092_v10  ;;  %v1095_v13 = vld [vmem:[#allocation8 + $0x64] ss:$8 sps:$4 sm:$0xff]   ;;  %v1097_v14 = vld [vmem:[#allocation8 + $0x60] ss:$8 sps:$4 sm:$0xff]   ;;  %p1309_p12 = scmp.lt.s32.totalorder %s941_s8, %s941_s8 }
  0x43   :  { %666 = vmatpush1.bf16.msra.mxu0 %v1094_v11  ;;  %v1098_v15 = vld [vmem:[#allocation8 + $0x54] ss:$8 sps:$4 sm:$0xff]   ;;  %v1103_v18 = vld [vmem:[#allocation8 + $0x50] ss:$8 sps:$4 sm:$0xff]   ;;  %v1104_v19 = vld [vmem:[#allocation8 + $0x44] ss:$8 sps:$4 sm:$0xff]  }
  0x44   :  { %186 = vmatpush1.bf16.msra.mxu1 %v1085_v4  ;;  %667 = vmatprep.subr.bf16.mxu0 %v1095_v13  ;;  %v1089_v16 = vld [vmem:[#allocation5 + $0x8] ss:$16 sps:$4 sm:$0xff]   ;;  %v1100_v20 = vld [vmem:[#allocation8 + $0x170] ss:$8 sps:$4 sm:$0xff]   ;;  %v1109_v22 = vld [vmem:[#allocation8 + $0x40] ss:$8 sps:$4 sm:$0xff]   ;;  %v107_v13 = vlaneseq }
  0x45   :  { %226 = vmatprep.subr.bf16.mxu1 %v1088_v7  ;;  %v1102_v17 = vld [vmem:[#allocation8 + $0x174] ss:$8 sps:$4 sm:$0xff]   ;;  %v1108_v21 = vld [vmem:[#allocation8 + $0x164] ss:$8 sps:$4 sm:$0xff]   ;;  %v1106_v24 = vld [vmem:[#allocation8 + $0x160] ss:$8 sps:$4 sm:$0xff]  }
  0x46   :  { %v1110_v23 = vld [vmem:[#allocation8 + $0x34] ss:$8 sps:$4 sm:$0xff]   ;;  %v1115_v26 = vld [vmem:[#allocation8 + $0x30] ss:$8 sps:$4 sm:$0xff]   ;;  %v1116_v27 = vld [vmem:[#allocation8 + $0x24] ss:$8 sps:$4 sm:$0xff]  }
  0x47   :  { %962 = vmatmul.mubr.msk.bf16.vlgmr.msra.gmra.mxu1 %vm167_vm0, %v96_v9  ;;  %668 = vmatpush1.bf16.msra.mxu0 %v1097_v14  ;;  %v1114_v25 = vld [vmem:[#allocation8 + $0x154] ss:$8 sps:$4 sm:$0xff]   ;;  %v1112_v28 = vld [vmem:[#allocation8 + $0x150] ss:$8 sps:$4 sm:$0xff]   ;;  %v1120_v29 = vld [vmem:[#allocation8 + $0x144] ss:$8 sps:$4 sm:$0xff]  }
  0x48   :  { %227 = vmatpush1.bf16.msra.mxu1 %v1086_v8  ;;  %246 = vmatprep.mubr.bf16.mxu1 %v1343_v0  ;;  %v1121_v30 = vld [vmem:[#allocation8 + $0x20] ss:$8 sps:$4 sm:$0xff]   ;;  %v1122_v31 = vld [vmem:[#allocation8 + $0x14] ss:$8 sps:$4 sm:$0xff]   ;;  %v1127_v34 = vld [vmem:[#allocation8 + $0x10] ss:$8 sps:$4 sm:$0xff]  }
  0x49   :  { %228 = vmatprep.subr.bf16.mxu1 %v1091_v12  ;;  %669 = vmatprep.subr.bf16.mxu0 %v1098_v15  ;;  %v1118_v32 = vld [vmem:[#allocation8 + $0x140] ss:$8 sps:$4 sm:$0xff]   ;;  %v1126_v33 = vld [vmem:[#allocation8 + $0x134] ss:$8 sps:$4 sm:$0xff]   ;;  %v1128_v35 = vld [vmem:[#allocation8 + $0x4] ss:$8 sps:$4 sm:$0xff]  }
  0x4a   :  { %v1124_v36 = vld [vmem:[#allocation8 + $0x130] ss:$8 sps:$4 sm:$0xff]   ;;  %v1132_v37 = vld [vmem:[#allocation8 + $0x124] ss:$8 sps:$4 sm:$0xff]   ;;  %v1133_v38 = vld [vmem:[#allocation8] ss:$8 sps:$4 sm:$0xff]  }
  0x4b   :  { %670 = vmatpush1.bf16.msra.mxu0 %v1103_v18  ;;  %v1134_v39 = vld [vmem:[#allocation8 + $0xf4] ss:$8 sps:$4 sm:$0xff]   ;;  %v1130_v40 = vld [vmem:[#allocation8 + $0x120] ss:$8 sps:$4 sm:$0xff]   ;;  %v1136_v42 = vld [vmem:[#allocation8 + $0x110] ss:$8 sps:$4 sm:$0xff]  }
  0x4c   :  { %229 = vmatpush1.bf16.msra.mxu1 %v1089_v16  ;;  %671 = vmatprep.subr.bf16.mxu0 %v1104_v19  ;;  %v1138_v41 = vld [vmem:[#allocation8 + $0x114] ss:$8 sps:$4 sm:$0xff]   ;;  %v1139_v43 = vld [vmem:[#allocation8 + $0xf0] ss:$8 sps:$4 sm:$0xff]   ;;  %v1140_v44 = vld [vmem:[#allocation8 + $0xe4] ss:$8 sps:$4 sm:$0xff]  }
  0x4d   :  { %708 = vmatprep.subr.bf16.mxu1 %v1102_v17  ;;  %v1144_v45 = vld [vmem:[#allocation8 + $0x104] ss:$8 sps:$4 sm:$0xff]   ;;  %v1145_v46 = vld [vmem:[#allocation8 + $0xe0] ss:$8 sps:$4 sm:$0xff]   ;;  %v1146_v47 = vld [vmem:[#allocation8 + $0xd4] ss:$8 sps:$4 sm:$0xff]  }
  0x4e   :  { %v1142_v48 = vld [vmem:[#allocation8 + $0x100] ss:$8 sps:$4 sm:$0xff]   ;;  %v1150_v49 = vld [vmem:[#allocation8 + $0x1f4] ss:$8 sps:$4 sm:$0xff]   ;;  %v1151_v50 = vld [vmem:[#allocation8 + $0xd0] ss:$8 sps:$4 sm:$0xff]  }
  0x4f   :  { %963 = vmatmul.mubr.msk.bf16.vlgmr.msra.gmra.mxu1 %vm167_vm0, %v96_v9  ;;  %672 = vmatpush1.bf16.msra.mxu0 %v1109_v22  ;;  %v1152_v51 = vld [vmem:[#allocation8 + $0xc4] ss:$8 sps:$4 sm:$0xff]   ;;  %v1148_v52 = vld [vmem:[#allocation8 + $0x1f0] ss:$8 sps:$4 sm:$0xff]   ;;  %v1157_v54 = vld [vmem:[#allocation8 + $0xc0] ss:$8 sps:$4 sm:$0xff]  }
  0x50   :  { %709 = vmatpush1.bf16.msra.mxu1 %v1100_v20  ;;  %673 = vmatprep.subr.bf16.mxu0 %v1110_v23  ;;  %v1156_v53 = vld [vmem:[#allocation8 + $0x1e4] ss:$8 sps:$4 sm:$0xff]   ;;  %v1158_v55 = vld [vmem:[#allocation8 + $0xb4] ss:$8 sps:$4 sm:$0xff]   ;;  %v1154_v56 = vld [vmem:[#allocation8 + $0x1e0] ss:$8 sps:$4 sm:$0xff]  }
  0x51   :  { %710 = vmatprep.subr.bf16.mxu1 %v1108_v21  ;;  %v1162_v57 = vld [vmem:[#allocation8 + $0x1d4] ss:$8 sps:$4 sm:$0xff]   ;;  %v1163_v58 = vld [vmem:[#allocation8 + $0xb0] ss:$8 sps:$4 sm:$0xff]   ;;  %v1164_v60 = vld [vmem:[#allocation8 + $0xa4] ss:$8 sps:$4 sm:$0xff]  }
  0x52   :  { %v1160_v59 = vld [vmem:[#allocation8 + $0x1d0] ss:$8 sps:$4 sm:$0xff]   ;;  %v1168_v61 = vld [vmem:[#allocation8 + $0x1c4] ss:$8 sps:$4 sm:$0xff]   ;;  %v1166_v62 = vld [vmem:[#allocation8 + $0x1c0] ss:$8 sps:$4 sm:$0xff]  }
  0x53   :  { %674 = vmatpush1.bf16.msra.mxu0 %v1115_v26  ;;  %v1169_v63 = vld [vmem:[#allocation8 + $0xa0] ss:$8 sps:$4 sm:$0xff]   ;;  %v1170_v0 = vld [vmem:[#allocation8 + $0x94] ss:$8 sps:$4 sm:$0xff]   ;;  %v1172_v2 = vld [vmem:[#allocation8 + $0x1b0] ss:$8 sps:$4 sm:$0xff]  }
  0x54   :  { %711 = vmatpush1.bf16.msra.mxu1 %v1106_v24  ;;  %675 = vmatprep.subr.bf16.mxu0 %v1116_v27  ;;  %v1174_v1 = vld [vmem:[#allocation8 + $0x1b4] ss:$8 sps:$4 sm:$0xff]   ;;  %v1175_v3 = vld [vmem:[#allocation8 + $0x90] ss:$8 sps:$4 sm:$0xff]   ;;  %v1176_v4 = vld [vmem:[#allocation8 + $0x84] ss:$8 sps:$4 sm:$0xff]  }
  0x55   :  { %712 = vmatprep.subr.bf16.mxu1 %v1114_v25  ;;  %v1180_v5 = vld [vmem:[#allocation8 + $0x1a4] ss:$8 sps:$4 sm:$0xff]   ;;  %v1178_v6 = vld [vmem:[#allocation8 + $0x1a0] ss:$8 sps:$4 sm:$0xff]   ;;  %v1184_v8 = vld [vmem:[#allocation8 + $0x194] ss:$8 sps:$4 sm:$0xff]  }
  0x56   :  { %v1181_v7 = vld [vmem:[#allocation8 + $0x80] ss:$8 sps:$4 sm:$0xff]   ;;  %v1182_v9 = vld [vmem:[#allocation8 + $0x190] ss:$8 sps:$4 sm:$0xff]   ;;  %v1187_v10 = vld [vmem:[#allocation8 + $0x184] ss:$8 sps:$4 sm:$0xff]  }
  0x57   :  { %676 = vmatpush1.bf16.msra.mxu0 %v1121_v30  ;;  %v1185_v11 = vld [vmem:[#allocation8 + $0x180] ss:$8 sps:$4 sm:$0xff]   ;;  %v1188_v12 = vld [vmem:[#allocation10 + $0x78] sm:$0xff]   ;;  %v1408_v14 = vshrl.u32 %v107_v13, 7  ;;  %s1304_s9 = scalar_lea.vmem %s941_s8, 256 }
  0x58   :  { %713 = vmatpush1.bf16.msra.mxu1 %v1112_v28  ;;  %677 = vmatprep.subr.bf16.mxu0 %v1122_v31  ;;  %v105_v17 = vld [vmem:[#allocation7] sm:$0xf]  ;;  %p1305_p11 = scmp.ne.s32.totalorder %s941_s8, %s1304_s9  ;;  %p1310_p13 = scmp.lt.s32.totalorder %s1304_s9, %s1304_s9 }
  0x59   :  { %714 = vmatprep.subr.bf16.mxu1 %v1120_v29  ;;  %v113_v15 = vsub.s32 1, %v1408_v14  ;;  %v109_v16 = vsub.s32 0, %v1408_v14  ;;  %v121_v25 = vsub.s32 3, %v1408_v14  ;;  %v117_v28 = vsub.s32 2, %v1408_v14 }
  0x5a   :  { %p1311_p0 = por %p1310_p13, %p1309_p12 }
  0x5b   :  { %678 = vmatpush1.bf16.msra.mxu0 %v1127_v34  ;;  %v114_v19 = vrot.slane %v105_v17, %v113_v15  ;;  %v110_v20 = vrot.slane %v105_v17, %v109_v16  ;;  %v122_v34 = vrot.slane %v105_v17, %v121_v25 }
  0x5c   :  { %715 = vmatpush1.bf16.msra.mxu1 %v1118_v32  ;;  %679 = vmatprep.subr.bf16.mxu0 %v1128_v35  ;;  %p1312_p1 = pnand %p1311_p0, %p1305_p11 }
  0x5d   :  { %716 = vmatprep.subr.bf16.mxu1 %v1126_v33 }
  0x5f   :  { %680 = vmatpush1.bf16.msra.mxu0 %v1133_v38 }
  0x60   :  { %717 = vmatpush1.bf16.msra.mxu1 %v1124_v36  ;;  %681 = vmatprep.subr.bf16.mxu0 %v1134_v39  ;;  %v118_v36 = vrot.slane %v105_v17, %v117_v28  ;;  %v1189_v39 = vld [vmem:[#allocation10 + $0x38] sm:$0xff]  }
  0x61   :  { %718 = vmatprep.subr.bf16.mxu1 %v1132_v37 }
  0x63   :  { %682 = vmatpush2.bf16.msra.mxu0 %v1139_v43 }
  0x64   :  { %719 = vmatpush1.bf16.msra.mxu1 %v1130_v40  ;;  %683 = vmatprep.subr.bf16.mxu0 %v1140_v44 }
  0x65   :  { %720 = vmatprep.subr.bf16.mxu1 %v1138_v41 }
  0x67   :  { %684 = vmatpush2.bf16.msra.mxu0 %v1145_v46 }
  0x68   :  { %721 = vmatpush1.bf16.msra.mxu1 %v1136_v42  ;;  %685 = vmatprep.subr.bf16.mxu0 %v1146_v47  ;;  %v1190_v42 = vld [vmem:[#allocation10 + $0x70] sm:$0xff]  }
  0x69   :  { %722 = vmatprep.subr.bf16.mxu1 %v1144_v45 }
  0x6b   :  { %686 = vmatpush2.bf16.msra.mxu0 %v1151_v50  ;;  %v1192_v50 = vld [vmem:[#allocation10 + $0x68] sm:$0xff]  }
  0x6c   :  { %723 = vmatpush1.bf16.msra.mxu1 %v1142_v48  ;;  %687 = vmatprep.subr.bf16.mxu0 %v1152_v51  ;;  %v1191_v48 = vld [vmem:[#allocation10 + $0x30] sm:$0xff]  }
  0x6d   :  { %724 = vmatprep.subr.bf16.mxu1 %v1150_v49 }
  0x6f   :  { %688 = vmatpush2.bf16.msra.mxu0 %v1157_v54 }
  0x70   :  { %725 = vmatpush2.bf16.msra.mxu1 %v1148_v52  ;;  %689 = vmatprep.subr.bf16.mxu0 %v1158_v55  ;;  %v1193_v55 = vld [vmem:[#allocation10 + $0x28] sm:$0xff]  }
  0x71   :  { %726 = vmatprep.subr.bf16.mxu1 %v1156_v53 }
  0x73   :  { %690 = vmatpush2.bf16.msra.mxu0 %v1163_v58  ;;  %v1195_v58 = vld [vmem:[#allocation10 + $0x20] sm:$0xff]  }
  0x74   :  { %727 = vmatpush2.bf16.msra.mxu1 %v1154_v56  ;;  %691 = vmatprep.subr.bf16.mxu0 %v1164_v60  ;;  %v1197_v60 = vld [vmem:[#allocation10 + $0x18] sm:$0xff]  }
  0x75   :  { %728 = vmatprep.subr.bf16.mxu1 %v1162_v57  ;;  %v1194_v57 = vld [vmem:[#allocation10 + $0x60] sm:$0xff]  }
  0x77   :  { %692 = vmatpush2.bf16.msra.mxu0 %v1169_v63  ;;  %v1200_v63 = vld [vmem:[#allocation10 + $0x48] sm:$0xff]  }
  0x78   :  { %729 = vmatpush2.bf16.msra.mxu1 %v1160_v59  ;;  %693 = vmatprep.subr.bf16.mxu0 %v1170_v0  ;;  %v1196_v59 = vld [vmem:[#allocation10 + $0x58] sm:$0xff]   ;;  %v1201_v0 = vld [vmem:[#allocation10 + $0x8] sm:$0xff]  }
  0x79   :  { %730 = vmatprep.subr.bf16.mxu1 %v1168_v61  ;;  %v1198_v61 = vld [vmem:[#allocation10 + $0x50] sm:$0xff]  }
  0x7b   :  { %694 = vmatpush2.bf16.msra.mxu0 %v1175_v3 }
  0x7c   :  { %731 = vmatpush2.bf16.msra.mxu1 %v1166_v62  ;;  %695 = vmatprep.subr.bf16.mxu0 %v1176_v4  ;;  %v1199_v62 = vld [vmem:[#allocation10 + $0x10] sm:$0xff]  }
  0x7d   :  { %732 = vmatprep.subr.bf16.mxu1 %v1174_v1  ;;  %v1202_v1 = vld [vmem:[#allocation10 + $0x40] sm:$0xff]  }
  0x7f   :  { %696 = vmatpush2.bf16.msra.mxu0 %v1181_v7 }
  0x80   :  { %733 = vmatpush2.bf16.msra.mxu1 %v1172_v2  ;;  %1045 = vmatprep.subr.bf16.mxu0 %v1188_v12  ;;  %v1203_v2 = vld [vmem:[#allocation10] sm:$0xff]  }
  0x81   :  { %734 = vmatprep.subr.bf16.mxu1 %v1180_v5  ;;  %v333_v5 = vld [vmem:[%s1438_s4] sm:$0x3] }
  0x82   :  { %v342_v7 = vrot.slane %v333_v5, %v113_v15 }
  0x84   :  { %735 = vmatpush2.bf16.msra.mxu1 %v1178_v6 }
  0x85   :  { %736 = vmatprep.subr.bf16.mxu1 %v1184_v8  ;;  %v338_v8 = vrot.slane %v333_v5, %v109_v16 }
  0x88   :  { %737 = vmatpush2.bf16.msra.mxu1 %v1182_v9 }
  0x89   :  { %738 = vmatprep.subr.bf16.mxu1 %v1187_v10 }
  0x8c   :  { %739 = vmatpush2.bf16.msra.mxu1 %v1185_v11 }
 0x107   :  { %v205_v18 = vpop.f32.mrf.mxu1 }
 0x108   :  { %v206_v26 = vadd.f32 %v205_v18, %v110_v20 }
 0x109   :  { %v207_v21 = vpop.f32.mrf.mxu1 }
 0x10a   :  { %v208_v23 = vadd.f32 %v207_v21, %v114_v19  ;;  %v257_v35 = vmax.f32 %v206_v26, 0.0 }
 0x10b   :  { %v209_v22 = vpop.f32.mrf.mxu1 }
 0x10c   :  { %v210_v24 = vadd.f32 %v209_v22, %v110_v20  ;;  %v258_v32 = vmax.f32 %v208_v23, 0.0 }
 0x10d   :  { %v211_v27 = vpop.f32.mrf.mxu1 }
 0x10e   :  { %v212_v29 = vadd.f32 %v211_v27, %v114_v19  ;;  %v261_v30 = vmax.f32 %v210_v24, 0.0 }
 0x10f   :  { %v248_v31 = vpop.f32.mrf.mxu1 }
 0x110   :  { %v262_v33 = vmax.f32 %v212_v29, 0.0  ;;  %v265_v40 = vpack.c.bf16 %v261_v30, %v257_v35  ;;  %v249_v45 = vadd.f32 %v248_v31, %v118_v36  ;;  %v1028_v29 = vld [vmem:[%s1440_s6] ss:$0 sm:$0xff] }
 0x111   :  { %v250_v37 = vpop.f32.mrf.mxu1 }
 0x112   :  { %v266_v38 = vpack.c.bf16 %v262_v33, %v258_v32  ;;  %v251_v43 = vadd.f32 %v250_v37, %v122_v34  ;;  %v259_v53 = vmax.f32 %v249_v45, 0.0 }
 0x113   :  { %v252_v41 = vpop.f32.mrf.mxu1 }
 0x114   :  { %v253_v44 = vadd.f32 %v252_v41, %v118_v36  ;;  %697 = vmatprep.mubr.bf16.mxu0 %v266_v38  ;;  %v260_v51 = vmax.f32 %v251_v43, 0.0 }
 0x115   :  { %v254_v46 = vpop.f32.mrf.mxu1  ;;  %698 = vmatmul.mubr.bf16.vlgmr.msra.gmra.mxu0 %v265_v40 }
 0x116   :  { %v255_v47 = vadd.f32 %v254_v46, %v122_v34  ;;  %1046 = vmatpush3.bf16.msra.mxu0 %v1189_v39  ;;  %v263_v49 = vmax.f32 %v253_v44, 0.0 }
 0x117   :  { %1047 = vmatprep.subr.bf16.mxu0 %v1190_v42 }
 0x118   :  { %v264_v52 = vmax.f32 %v255_v47, 0.0  ;;  %v267_v56 = vpack.c.bf16 %v263_v49, %v259_v53 }
 0x11a   :  { %v268_v54 = vpack.c.bf16 %v264_v52, %v260_v51  ;;  %1048 = vmatpush3.bf16.msra.mxu0 %v1191_v48 }
 0x11b   :  { %1049 = vmatprep.subr.bf16.mxu0 %v1192_v50 }
 0x11c   :  { %740 = vmatprep.mubr.bf16.mxu1 %v268_v54 }
 0x11d   :  { %741 = vmatmul.mubr.bf16.vlgmr.msra.gmra.mxu1 %v267_v56 }
 0x11e   :  { %1050 = vmatpush3.bf16.msra.mxu0 %v1193_v55 }
 0x11f   :  { %1051 = vmatprep.subr.bf16.mxu0 %v1194_v57 }
 0x122   :  { %1052 = vmatpush3.bf16.msra.mxu0 %v1195_v58 }
 0x123   :  { %1053 = vmatprep.subr.bf16.mxu0 %v1196_v59 }
 0x126   :  { %1054 = vmatpush3.bf16.msra.mxu0 %v1197_v60 }
 0x127   :  { %1055 = vmatprep.subr.bf16.mxu0 %v1198_v61 }
 0x12a   :  { %1056 = vmatpush3.bf16.msra.mxu0 %v1199_v62 }
 0x12b   :  { %1057 = vmatprep.subr.bf16.mxu0 %v1200_v63 }
 0x12e   :  { %1058 = vmatpush3.bf16.msra.mxu0 %v1201_v0 }
 0x12f   :  { %1059 = vmatprep.subr.bf16.mxu0 %v1202_v1 }
 0x132   :  { %1060 = vmatpush3.bf16.msra.mxu0 %v1203_v2 }
 0x1d5   :  { %v699_v3 = vpop.f32.mrf.mxu0 }
 0x1d6   :  { %v700_v17 = vadd.f32 %v699_v3, %v338_v8 }
 0x1d7   :  { %v701_v4 = vpop.f32.mrf.mxu0 }
 0x1d8   :  { %v702_v12 = vadd.f32 %v701_v4, %v342_v7 }
 0x1d9   :  { %v703_v6 = vpop.f32.mrf.mxu0 }
 0x1da   :  { %v704_v13 = vadd.f32 %v703_v6, %v338_v8 }
 0x1db   :  { %v705_v10 = vpop.f32.mrf.mxu0 }
 0x1dc   :  { %v706_v19 = vadd.f32 %v705_v10, %v342_v7 }
 0x1dd   :  { %v742_v9 = vpop.f32.mrf.mxu1 }
 0x1de   :  { %v743_v22 = vadd.f32 %v742_v9, %v700_v17 }
 0x1df   :  { %v744_v11 = vpop.f32.mrf.mxu1 }
 0x1e0   :  { %v745_v20 = vadd.f32 %v744_v11, %v702_v12  ;;  %v751_v15 = vmax.f32 %v743_v22, 0.0 }
 0x1e1   :  { %v746_v18 = vpop.f32.mrf.mxu1 }
 0x1e2   :  { %v747_v21 = vadd.f32 %v746_v18, %v704_v13  ;;  %v752_v26 = vmax.f32 %v745_v20, 0.0 }
 0x1e3   :  { %v748_v23 = vpop.f32.mrf.mxu1 }
 0x1e4   :  { %v749_v24 = vadd.f32 %v748_v23, %v706_v19  ;;  %v753_v25 = vmax.f32 %v747_v21, 0.0 }
 0x1e6   :  { %v754_v27 = vmax.f32 %v749_v24, 0.0  ;;  %v755_v14 = vpack.c.bf16 %v753_v25, %v751_v15 }
 0x1e8   :  { %v756_v28 = vpack.c.bf16 %v754_v27, %v752_v26 }
 0x1ea   :  { %924 = vmatprep.mubr.bf16.mxu0 %v756_v28 }
 0x1eb   :  { %925 = vmatmul.mubr.bf16.vlgmr.msra.gmra.mxu0 %v755_v14 }
 0x2ab   :  { %v1061_v16 = vpop.f32.mrf.mxu0 }
 0x2ad   :  { %v1062_v30 = vpop.f32.mrf.mxu0 }
 0x2ae   :  { %v1063_v31 = vadd.f32 %v1062_v30, %v1061_v16 }
 0x2af   :  { %v1064_v32 = vpop.f32.mrf.mxu0 }
 0x2b0   :  { %v927_v33 = vadd.f32 %v1063_v31, %v1028_v29 }
 0x2b1   :  { %v1065_v34 = vpop.f32.mrf.mxu0 }
 0x2b2   :  { %933 = vst [vmem:[#allocation11] sm:$0xff] %v927_v33  ;;  %v1066_v35 = vadd.f32 %v1065_v34, %v1064_v32 }
 0x2b4   :  { %v930_v36 = vadd.f32 %v1066_v35, %v1028_v29 }
 0x2b6   :  { %934 = vst [vmem:[#allocation11 + $0x8] sm:$0xff] %v930_v36 }
 0x2b7   :  { %1315 = shalt.err (!%p1312_p1)
}
 0x2b8   :  { %946 = dma.vmem_to_hbm [thread:$0]  %s941_s8, 256, %s1441_s7, [#allocation4], %s1337_s13, %s1337_s13, %s1338_s14  }
 0x2b9   :  { %1330 = dma.done.wait [#allocation4], 256  }
 0x2ba   :  { %1331 = vsyncadd [#allocation4], 4294967040 }
 0x2bb   :  { %950 = vsyncpa [#allocation3], 1 }
 0x2bc   :  { %951 = vsyncpa [#allocation6], 1 }
 0x2bd   :  { %952 = vsyncpa [#allocation9], 1 }
 0x2be   :  { %953 = vsyncpa [#allocation4], 1 }

</bundles_post_ra>
